<compile_context>
chip_gen: v5e
topology: v5e:2x2
jax: 0.10.0
libtpu: 0.0.40
codegen_flags: <defaults>
</compile_context>

<pallas_src>
import jax
import jax.numpy as jnp
from jax.experimental import pallas as pl
from jax.experimental.pallas import tpu as pltpu


def _eca_kernel(w_ref, x_ref, o_ref):
    # w_ref: (k,) float32 Conv1d taps in SMEM.
    # x_ref / o_ref: (1, C, H*W) blocks in VMEM (one batch element per grid step).
    x = x_ref[...]
    _, C, HW = x.shape
    k = w_ref.shape[0]
    pad = k // 2

    # Global average pool over the spatial (lane) axis, f32 accumulation -> (1, C).
    pooled = jnp.sum(x.astype(jnp.float32), axis=-1) * (1.0 / HW)

    # Conv1d (cross-correlation) across channels with zero padding:
    #   conv[c] = sum_j w[j] * pooled[c + j - pad]   (zero outside [0, C))
    # Implemented as k shifted multiply-accumulates (XLU roll + VPU FMA),
    # instead of a (C, C) banded matmul.
    if k > 1:
        ch = jax.lax.broadcasted_iota(jnp.int32, (1, C), 1)
    conv = jnp.zeros((1, C), jnp.float32)
    for j in range(k):
        off = j - pad
        if off == 0:
            term = pooled
        else:
            shifted = pltpu.roll(pooled, shift=(-off) % C, axis=1)
            valid = (ch + off >= 0) & (ch + off < C)
            term = jnp.where(valid, shifted, 0.0)
        conv = conv + w_ref[j] * term

    # Sigmoid gate (EUP) and broadcast multiply back over the spatial lanes.
    att = jax.nn.sigmoid(conv)                      # (1, C) float32
    o_ref[...] = (x * att[:, :, None]).astype(o_ref.dtype)


def eca_forward(x, conv_weight):
    """ECA forward. x: (B, C, H, W); conv_weight: (1, 1, k) Conv1d weight (no bias)."""
    B, C, H, W = x.shape
    k = int(conv_weight.shape[-1])
    assert k % 2 == 1, "ECA uses an odd kernel size so the conv output length == C"
    HW = H * W

    # Lane-dense view; free for contiguous NCHW data.
    x2 = x.reshape(B, C, HW)
    w = conv_weight.reshape(k).astype(jnp.float32)

    # VMEM budget: input + output blocks, each double-buffered, padded to (8, 128).
    tile_rows = -(-C // 8) * 8
    tile_cols = -(-HW // 128) * 128
    block_bytes = tile_rows * tile_cols * x2.dtype.itemsize
    vmem_limit = int(min(max(4 * block_bytes + (2 << 20), 16 << 20), 48 << 20))
    # TODO(synk): for very large feature maps (per-batch block > ~12 MiB, tight on
    # v7x's 64 MiB VMEM) switch to a two-pass design: pass 1 pools spatial tiles
    # into a (B, C, 1) attention tensor, pass 2 applies the gate tiled over
    # (batch, spatial) so both v7x TensorCores get work even at batch 1.

    out = pl.pallas_call(
        _eca_kernel,
        out_shape=jax.ShapeDtypeStruct((B, C, HW), x.dtype),
        grid_spec=pltpu.PrefetchScalarGridSpec(
            num_scalar_prefetch=0,
            grid=(B,),
            in_specs=[
                pl.BlockSpec(memory_space=pltpu.MemorySpace.SMEM),   # conv taps (k,)
                pl.BlockSpec((1, C, HW), lambda b: (b, 0, 0)),       # x block
            ],
            out_specs=pl.BlockSpec((1, C, HW), lambda b: (b, 0, 0)),
        ),
        compiler_params=pltpu.CompilerParams(
            dimension_semantics=("parallel",),
            vmem_limit_bytes=vmem_limit,
        ),
    )(w, x2)
    return out.reshape(B, C, H, W)


def eca_reference(x, conv_weight):
    """Pure-JAX reference mirroring the PyTorch forward."""
    B, C, H, W = x.shape
    k = int(conv_weight.shape[-1])
    pad = k // 2
    pooled = jnp.mean(x.astype(jnp.float32), axis=(2, 3))  # (B, C)
    w = conv_weight.reshape(k).astype(jnp.float32)
    padded = jnp.pad(pooled, ((0, 0), (pad, pad)))
    conv = jnp.stack(
        [jnp.sum(padded[:, c:c + k] * w[None, :], axis=-1) for c in range(C)],
        axis=-1,
    )  # (B, C)
    att = jax.nn.sigmoid(conv)
    return x * att[:, :, None, None].astype(x.dtype)


if __name__ == "__main__":
    key = jax.random.PRNGKey(0)
    kx, kw = jax.random.split(key)

    B, C, H, W = 2, 4, 16, 16
    k = 3  # ECA kernel size (odd)

    x = jax.random.normal(kx, (B, C, H, W), dtype=jnp.float32)
    # nn.Conv1d(1, 1, kernel_size=k, bias=False) weight has shape (1, 1, k)
    conv_weight = jax.random.normal(kw, (1, 1, k), dtype=jnp.float32) * 0.5

    y = eca_forward(x, conv_weight)
    y = jax.block_until_ready(y)

    y_ref = eca_reference(x, conv_weight)
    assert jnp.allclose(y, y_ref, atol=1e-5, rtol=1e-5), "mismatch vs reference"

    print("KERNEL_OK")
</pallas_src>

<mosaic_0001>
module attributes {stable_mosaic.version = 11 : i64} {
  func.func @_eca_kernel(%arg0: i32, %arg1: memref<3xf32, #tpu.memory_space<smem>>, %arg2: memref<1x4x256xf32, #tpu.memory_space<vmem>>, %arg3: memref<1x4x256xf32, #tpu.memory_space<vmem>>) attributes {dimension_semantics = [#tpu.dimension_semantics<parallel>], iteration_bounds = array<i64: 2>, scalar_prefetch = 0 : i64, scratch_operands = 0 : i64, tpu.core_type = #tpu.core_type<tc>, window_params = [{transform_indices = @transform_0, window_bounds = array<i64: 3>}, {transform_indices = @transform_1, window_bounds = array<i64: 1, 4, 256>}, {transform_indices = @transform_2, window_bounds = array<i64: 1, 4, 256>}]} {
    %c0 = arith.constant 0 : index
    %c0_0 = arith.constant 0 : index
    %c0_1 = arith.constant 0 : index
    %0 = vector.load %arg2[%c0, %c0_0, %c0_1] : memref<1x4x256xf32, #tpu.memory_space<vmem>>, vector<1x4x256xf32>
    %cst = arith.constant dense<0.000000e+00> : vector<1x4xf32>
    %1 = vector.multi_reduction <add>, %0, %cst [2] : vector<1x4x256xf32> to vector<1x4xf32>
    %cst_2 = arith.constant 3.906250e-03 : f32
    %2 = vector.broadcast %cst_2 : f32 to vector<1x4xf32>
    %3 = arith.mulf %1, %2 : vector<1x4xf32>
    %4 = tpu.iota {dimensions = array<i32: 1>} : vector<1x4xi32>
    %cst_3 = arith.constant 0.000000e+00 : f32
    %5 = vector.broadcast %cst_3 : f32 to vector<1x4xf32>
    %c1_i32 = arith.constant 1 : i32
    %6 = tpu.dynamic_rotate %3 by %c1_i32 dim 1 : vector<1x4xf32>, i32 -> vector<1x4xf32>
    %c-1_i32 = arith.constant -1 : i32
    %7 = vector.broadcast %c-1_i32 : i32 to vector<1x4xi32>
    %8 = arith.addi %4, %7 : vector<1x4xi32>
    %c0_i32 = arith.constant 0 : i32
    %9 = vector.broadcast %c0_i32 : i32 to vector<1x4xi32>
    %10 = arith.cmpi sge, %8, %9 : vector<1x4xi32>
    %c-1_i32_4 = arith.constant -1 : i32
    %11 = vector.broadcast %c-1_i32_4 : i32 to vector<1x4xi32>
    %12 = arith.addi %4, %11 : vector<1x4xi32>
    %c4_i32 = arith.constant 4 : i32
    %13 = vector.broadcast %c4_i32 : i32 to vector<1x4xi32>
    %14 = arith.cmpi slt, %12, %13 : vector<1x4xi32>
    %15 = arith.andi %10, %14 : vector<1x4xi1>
    %cst_5 = arith.constant 0.000000e+00 : f32
    %16 = vector.broadcast %cst_5 : f32 to vector<1x4xf32>
    %17 = arith.select %15, %6, %16 : vector<1x4xi1>, vector<1x4xf32>
    %c0_6 = arith.constant 0 : index
    %18 = memref.load %arg1[%c0_6] : memref<3xf32, #tpu.memory_space<smem>>
    %19 = vector.broadcast %18 : f32 to vector<1x4xf32>
    %20 = arith.mulf %19, %17 : vector<1x4xf32>
    %21 = arith.addf %5, %20 : vector<1x4xf32>
    %c1 = arith.constant 1 : index
    %22 = memref.load %arg1[%c1] : memref<3xf32, #tpu.memory_space<smem>>
    %23 = vector.broadcast %22 : f32 to vector<1x4xf32>
    %24 = arith.mulf %23, %3 : vector<1x4xf32>
    %25 = arith.addf %21, %24 : vector<1x4xf32>
    %c3_i32 = arith.constant 3 : i32
    %26 = tpu.dynamic_rotate %3 by %c3_i32 dim 1 : vector<1x4xf32>, i32 -> vector<1x4xf32>
    %c1_i32_7 = arith.constant 1 : i32
    %27 = vector.broadcast %c1_i32_7 : i32 to vector<1x4xi32>
    %28 = arith.addi %4, %27 : vector<1x4xi32>
    %c0_i32_8 = arith.constant 0 : i32
    %29 = vector.broadcast %c0_i32_8 : i32 to vector<1x4xi32>
    %30 = arith.cmpi sge, %28, %29 : vector<1x4xi32>
    %c1_i32_9 = arith.constant 1 : i32
    %31 = vector.broadcast %c1_i32_9 : i32 to vector<1x4xi32>
    %32 = arith.addi %4, %31 : vector<1x4xi32>
    %c4_i32_10 = arith.constant 4 : i32
    %33 = vector.broadcast %c4_i32_10 : i32 to vector<1x4xi32>
    %34 = arith.cmpi slt, %32, %33 : vector<1x4xi32>
    %35 = arith.andi %30, %34 : vector<1x4xi1>
    %cst_11 = arith.constant 0.000000e+00 : f32
    %36 = vector.broadcast %cst_11 : f32 to vector<1x4xf32>
    %37 = arith.select %35, %26, %36 : vector<1x4xi1>, vector<1x4xf32>
    %c2 = arith.constant 2 : index
    %38 = memref.load %arg1[%c2] : memref<3xf32, #tpu.memory_space<smem>>
    %39 = vector.broadcast %38 : f32 to vector<1x4xf32>
    %40 = arith.mulf %39, %37 : vector<1x4xf32>
    %41 = arith.addf %25, %40 : vector<1x4xf32>
    %42 = arith.negf %41 : vector<1x4xf32>
    %43 = math.exp %42 : vector<1x4xf32>
    %cst_12 = arith.constant 1.000000e+00 : f32
    %44 = vector.broadcast %cst_12 : f32 to vector<1x4xf32>
    %45 = arith.addf %44, %43 : vector<1x4xf32>
    %46 = arith.divf %44, %45 : vector<1x4xf32>
    %47 = vector.shape_cast %46 : vector<1x4xf32> to vector<1x4x1xf32>
    %48 = vector.broadcast %47 : vector<1x4x1xf32> to vector<1x4x256xf32>
    %49 = arith.mulf %0, %48 : vector<1x4x256xf32>
    %c0_13 = arith.constant 0 : index
    %c0_14 = arith.constant 0 : index
    %c0_15 = arith.constant 0 : index
    %50 = vector.load %arg3[%c0_13, %c0_14, %c0_15] : memref<1x4x256xf32, #tpu.memory_space<vmem>>, vector<1x4x256xf32>
    tpu.vector_store %arg3[%c0_13, %c0_14, %c0_15], %49 {strides = array<i32>} : memref<1x4x256xf32, #tpu.memory_space<vmem>>, vector<1x4x256xf32>,
    return
  }
  func.func @transform_0(%arg0: i32) -> i32 {
    %c0_i32 = arith.constant 0 : i32
    %c0_i32_0 = arith.constant 0 : i32
    return %c0_i32 : i32
  }
  func.func @transform_1(%arg0: i32) -> (i32, i32, i32) {
    %c0_i32 = arith.constant 0 : i32
    %c0_i32_0 = arith.constant 0 : i32
    %c0_i32_1 = arith.constant 0 : i32
    return %arg0, %c0_i32, %c0_i32_0 : i32, i32, i32
  }
  func.func @transform_2(%arg0: i32) -> (i32, i32, i32) {
    %c0_i32 = arith.constant 0 : i32
    %c0_i32_0 = arith.constant 0 : i32
    %c0_i32_1 = arith.constant 0 : i32
    return %arg0, %c0_i32, %c0_i32_0 : i32, i32, i32
  }
}

</mosaic_0001>

<bundles_post_ra>
// kernel: tpu_custom_call.1
= control target key start
LH: loop header
LB: loop body
LE: loop exit
PB: predicated region body
PF: predicated region fallthrough
CT: control target
= control target key end

     0   :  { %7 = vsyncpa [#allocation5], 0  ;;  %s738_s0 = inlined_call_operand.hbm [shape: f32[3], index: 0, kind: input, shape index: {}]   ;;  %s739_s1 = inlined_call_operand.hbm [shape: f32[2,4,256], index: 1, kind: input, shape index: {}]   ;;  %s740_s2 = inlined_call_operand.hbm [shape: f32[2,4,256], index: 2, kind: output, shape index: {}]  }
   0x1   :  { %8 = vsyncpa [#allocation3], 0 }
   0x2   :  { %10 = vsyncpa [#allocation3 + $0x1], 0 }
   0x3   :  { %11 = vsyncpa [#allocation4], 0 }
   0x4   :  { %13 = vsyncpa [#allocation4 + $0x1], 0  ;;  %s592_s9 = smov 0   ;;  %s594_s10 = smov 0  }
   0x5   :  { %s596_s11 = smov 0   ;;  %s598_s12 = smov 0  }
   0x6 LB: > { %s613_s13 = sadd.s32 4294967295, %s570_s12   ;;  %s367_s14 = sadd.s32 4294967294, %s570_s12   ;;  %s570_s12 = sphi %s598_s12, %s750_s12   ;;  %s566_s11 = sphi %s596_s11, %s749_s11   ;;  %s562_s10 = sphi %s594_s10, %s748_s10   ;;  %s558_s9 = sphi %s592_s9, %s747_s9  }
   0x7   : > { %p60_p0 = scmp.ne.s32.totalorder %s562_s10, %s558_s9  ;;  %p61_p1 = scmp.eq.s32.totalorder %s613_s13, 0 }
   0x8   : > { %p84_p2 = scmp.eq.s32.totalorder %s613_s13, 1  ;;  %p90_p3 = scmp.eq.s32.totalorder %s367_s14, 1 }
   0x9   : > { %p622_p4 = por %p61_p1, %p60_p0  ;;  %p368_p5 = scmp.ge.s32.totalorder %s570_s12, 1 }
   0xa   : > { %p627_p6 = por %p90_p3, %p60_p0  ;;  %p97_p7 = scmp.lt.s32.totalorder %s570_s12, 3 }
   0xb   : > { %s109_s19 = sshll.u32 %s738_s0, 4  ;;  %s643_s21 = sadd.s32 1, %s570_s12   ;;  %s110_s19 = int_to_ptr.hbm [resolvable:$true] %s109_s19 }
   0xc   : > { %p635_p8 = pnand %p368_p5, %p97_p7  ;;  %s44_s22 = ssub.s32 %s570_s12, %s643_s21 }
   0xd   : > { %p45_p12 = scmp.eq.s32.totalorder %s44_s22, 0  ;;  %s47_s23 = sadd.s32 1, %s566_s11 }
   0xe   : > { %p396_p10 = pneg %p635_p8  ;;  %p54_p13 = scmp.ne.s32.totalorder %s566_s11, %s562_s10 }
   0xf   : > { %s572_s24 = smov [#allocation2]   ;;  %p55_p0 = scmp.eq.s32.totalorder %s570_s12, 0 }
  0x10   : > { %p397_p11 = pnand %p396_p10, %p61_p1  ;;  %p658_p3 = por %p84_p2, %p54_p13 }
  0x11   : > { %s653_s25 = scalar_select %p45_p12, %s566_s11, %s47_s23  }
  0x12   : > { %399 = dma.hbm_to_smem (!%p397_p11), %s110_s19, 16, %s572_s24, [#allocation5]  }
  0x13   : > { %s120_s27 = sand.u32 1, %s566_s11   ;;  %p56_p5 = por %p55_p0, %p54_p13 }
  0x14   : > { %p409_p7 = scmp.lt.s32.totalorder %s570_s12, 2  ;;  %s371_s28 = sshll.u32 %s120_s27, 3 }
  0x15   : > { %s386_s29 = sshll.u32 %s570_s12, 3  ;;  %s124_s6 = scalar_lea.vmem [#allocation6], %s371_s28 }
  0x16   : > { %s129_s4 = scalar_lea.hbm %s739_s1, %s386_s29  ;;  %s133_s7 = sshll.u32 %s124_s6, 4  ;;  %s134_s7 = int_to_ptr.vmem [resolvable:$true] %s133_s7 }
  0x17   : > { %s131_s5 = sshll.u32 %s129_s4, 4  ;;  %p668_p10 = pnand %p409_p7, %p56_p5  ;;  %s132_s5 = int_to_ptr.hbm [resolvable:$true] %s131_s5 }
  0x18   : > { %s121_s14 = scalar_lea.sflag [#allocation3], %s120_s27  ;;  %s470_s17 = sshra.s32 %s132_s5, 4  ;;  %s471_s17 = int_to_ptr.hbm [resolvable:$true] %s470_s17 }
  0x19   : > { %s472_s18 = scalar_lea.hbm %s471_s17, 8  ;;  %p474_p11 = pneg %p668_p10 }
  0x1a   : > { %p473_p2 = scmp.ne.s32.totalorder %s471_s17, %s472_s18  ;;  %s477_s23 = scalar_lea.hbm %s739_s1, 16 }
  0x1b   : > { %p478_p0 = scmp.lt.s32.totalorder %s471_s17, %s739_s1  ;;  %p479_p5 = scmp.lt.s32.totalorder %s477_s23, %s472_s18 }
  0x1c   : > { %p475_p12 = pnand %p474_p11, %p473_p2 }
  0x1d   : > { %p480_p7 = por %p479_p5, %p478_p0 }
  0x1e   : > { %p476_p13 = pneg %p475_p12 }
  0x20   : > { %p481_p9 = pnand %p480_p7, %p476_p13 }
  0x22   : > { %484 = shalt.err (!%p481_p9)
}
  0x23   : > { %403 = dma.hbm_to_vmem [thread:$0]  (!%p668_p10), %s132_s5, 128, %s134_s7, %s121_s14  }
  0x24   : > { %142 = sbr.rel (%p635_p8) target bundleno = 662 (0x296), region = 28 }
  0x29   : > { %545 = dma.done.wait (%p61_p1), [#allocation5], 16  }
  0x2a   : > { %547 = vsyncadd (%p61_p1), [#allocation5], 4294967280  ;;  %s689_s27 = sand.u32 1, %s562_s10  }
  0x2b   : > { %s376_s29 = sshll.u32 %s689_s27, 3  ;;  %s150_s30 = scalar_lea.sflag [#allocation3], %s689_s27 }
  0x2c   : > { %s153_s3 = scalar_lea.vmem [#allocation6], %s376_s29 }
  0x2d   : > { %549 = dma.done.wait (%p622_p4), %s150_s30, 128  }
  0x2e   : > { %551 = vsyncadd (%p622_p4), %s150_s30, 4294967168 }
  0x2f   : > { %159 = sfence }
  0x30   : > { %v699_v0 = vld [vmem:[%s153_s3] sm:$0xff]  ;;  %vm183_vm0 = vcmask 1043456   ;;  %v190_v6 = vlaneseq  ;;  %s573_s20 = smov 4   ;;  %vm195_vm1 = vcmask 1047584   ;;  %s574_s15 = smov 127  }
  0x31   : > { %178 = vst [vmem:[#allocation1] ss:$2 sm:$0xff] %v699_v0  ;;  %s575_s4 = smov 125   ;;  %s378_s5 = sld [smem:[#allocation2 + $0x1]]  ;;  %v576_v45 = vmov 839922192  }
  0x32   : > { %v191_v7 = vand.u32 127, %v190_v6  ;;  %v255_v15 = vshrl.u32 %v190_v6, 7  ;;  %s211_s6 = sld [smem:[#allocation2]]  ;;  %v262_v46 = vunpack.c.l.s4 %v576_v45  ;;  %s387_s8 = sshll.u32 %s613_s13, 3 }
  0x33   : > { %s379_s7 = sld [smem:[#allocation2 + $0x2]]  ;;  %s280_s18 = scalar_lea.hbm %s740_s2, %s387_s8 }
  0x34   : > { %449 = vset.pattern.permute.xlu2 %v255_v15  ;;  %450 = vset.pattern.permute.xlu0 %v255_v15  ;;  %v202_v16 = vadd.s32 4294967295, %v191_v7  ;;  %v222_v17 = vadd.s32 1, %v191_v7  ;;  %v263_v47 = vunpack.c.0.s8 %v262_v46  ;;  %s175_s19 = scalar_lea.vmem [#allocation7], %s376_s29  ;;  %s284_s23 = sshll.u32 %s280_s18, 4  ;;  %s285_s23 = int_to_ptr.hbm [resolvable:$true] %s284_s23 }
  0x35   : > { %s282_s22 = sshll.u32 %s175_s19, 4  ;;  %s269_s24 = scalar_lea.sflag [#allocation4], %s689_s27  ;;  %s283_s22 = int_to_ptr.vmem [resolvable:$true] %s282_s22 }
  0x36   : > { %vm203_vm2 = vcmp.ge.s32.totalorder %v202_v16, 0  ;;  %vm204_vm3 = vcmp.lt.s32.totalorder %v202_v16, 4  ;;  %vm224_vm4 = vcmp.lt.s32.totalorder %v222_v17, 4  ;;  %s514_s28 = sshra.s32 %s285_s23, 4  ;;  %s520_s29 = scalar_lea.hbm %s740_s2, 16  ;;  %s515_s28 = int_to_ptr.hbm [resolvable:$true] %s514_s28 }
  0x37   : > { %v216_v18 = vstv %s378_s5  ;;  %vm205_vm5 = vmand %vm203_vm2, %vm204_vm3  ;;  %s516_s13 = scalar_lea.hbm %s515_s28, 8  ;;  %p521_p9 = scmp.lt.s32.totalorder %s515_s28, %s740_s2 }
  0x38   : > { %v179_v1 = vld.sshfl [vmem:[#allocation1] sm:$0xff pattern:$0x75316420]  ;;  %v180_v2 = vld.sshfl [vmem:[#allocation1 + $0x8] sm:$0xff pattern:$0x75316420]  ;;  %v212_v21 = vstv %s211_s6  ;;  %p517_p1 = scmp.ne.s32.totalorder %s515_s28, %s516_s13  ;;  %p522_p10 = scmp.lt.s32.totalorder %s520_s29, %s516_s13 }
  0x39   : > { %v184_v3 = vsel %vm183_vm0, %v179_v1, 0.0  ;;  %v185_v4 = vsel %vm183_vm0, %v180_v2, 0.0  ;;  %v231_v23 = vstv %s379_s7 }
  0x3a   : > { %v186_v5 = vadd.f32 %v185_v4, %v184_v3  ;;  %p518_p4 = pnand %p517_p1, %p658_p3  ;;  %p523_p2 = por %p522_p10, %p521_p9 }
  0x3c   : > { %187 = vadd.xlane.f32.xlu0 %v186_v5  ;;  %p519_p8 = pneg %p518_p4 }
  0x3e   : > { %p524_p11 = pnand %p523_p2, %p519_p8 }
  0xaf   : > { %v188_v8 = vpop.xlane.xlu0 %187 }
  0xb0   : > { %v189_v9 = vmul.f32 0.00390625, %v188_v8 }
  0xb2   : > { %v193_v10 = vperm.slane %v189_v9, %v191_v7  ;;  %v217_v19 = vmul.f32 %v216_v18, %v189_v9 }
  0xb4   : > { %196 = vrot.lane.b32.xlu0 %v193_v10, %s573_s20  ;;  %v219_v26 = vperm.slane %v217_v19, %v191_v7 }
 0x126   : > { %v197_v11 = vpop.permute.xlu0 %196 }
 0x127   : > { %v198_v12 = vsel %vm195_vm1, %v197_v11, %v193_v10 }
 0x128   : > { %199 = vrot.lane.b32.xlu1 %v198_v12, %s573_s20 }
 0x19a   : > { %v200_v13 = vpop.permute.xlu1 %199 }
 0x19b   : > { %v201_v14 = vsel %vm195_vm1, %v200_v13, %v193_v10 }
 0x19c   : > { %226 = vrot.lane.b32.xlu2 %v201_v14, %s574_s15  ;;  %207 = vrot.lane.b32.xlu1 %v201_v14, %s575_s4 }
 0x1f6   : > { %v227_v20 = vpop.permute.xlu2 %226 }
 0x1f7   : > { %v229_v24 = vsel %vm224_vm4, %v227_v20, 0.0 }
 0x1f8   : > { %v232_v28 = vmul.f32 %v231_v23, %v229_v24 }
 0x20e   : > { %v208_v22 = vpop.permute.xlu1 %207 }
 0x20f   : > { %v210_v25 = vsel %vm205_vm5, %v208_v22, 0.0 }
 0x210   : > { %v213_v27 = vmul.f32 %v212_v21, %v210_v25 }
 0x212   : > { %v221_v29 = vadd.f32 %v219_v26, %v213_v27 }
 0x214   : > { %v233_v30 = vadd.f32 %v232_v28, %v221_v29 }
 0x216   : > { %v380_v31 = vmul.f32 -1.442695, %v233_v30 }
 0x218   : > { %451 = vpow2.f32 %v380_v31 }
 0x21e   : > { %v452_v32 = vpop.eup %451 }
 0x21f   : > { %v237_v33 = vadd.f32 1.0, %v452_v32 }
 0x221   : > { %453 = vrcp.f32 %v237_v33  ;;  %v249_v37 = vand.u32 2147483648, %v237_v33  ;;  %v247_v39 = vand.u32 2147483647, %v237_v33  ;;  %vm243_vm7 = vweird.f32 %v237_v33 }
 0x223   : > { %v250_v41 = vor.u32 1.1754944e-38, %v249_v37  ;;  %vm248_vm9 = vcmp.eq.f32.partialorder %v247_v39, 8.507059e+37 }
 0x227   : > { %v454_v34 = vpop.eup %453 }
 0x228   : > { %v239_v35 = vmul.f32 %v454_v34, %v237_v33  ;;  %vm244_vm6 = vweird.f32 %v454_v34 }
 0x229   : > { %vm245_vm8 = vmor %vm243_vm7, %vm244_vm6 }
 0x22a   : > { %v240_v36 = vsub.f32 1.0, %v239_v35 }
 0x22c   : > { %v241_v38 = vmul.f32 %v454_v34, %v240_v36 }
 0x22e   : > { %v242_v40 = vadd.f32 %v454_v34, %v241_v38 }
 0x230   : > { %v246_v42 = vsel %vm245_vm8, %v454_v34, %v242_v40 }
 0x231   : > { %v251_v43 = vsel %vm248_vm9, %v250_v41, %v246_v42 }
 0x232   : > { %v253_v44 = vperm.slane %v251_v43, 0 }
 0x234   : > { %258 = vperm.xlu2 %449, %v253_v44  }
 0x28e   : > { %v259_v48 = vpop.permute.xlu2 %258 }
 0x28f   : > { %v264_v49 = vperm.slane %v259_v48, %v263_v47 }
 0x291   : > { %v266_v50 = vmul.f32 %v264_v49, %v699_v0 }
 0x293   : > { %267 = vst [vmem:[%s175_s19] sm:$0xff] %v266_v50 }
 0x294   : > { %527 = shalt.err (!%p524_p11)
}
 0x295   : > { %394 = dma.vmem_to_hbm [thread:$0]  (%p658_p3), %s283_s22, 128, %s285_s23, %s269_s24  }
 0x296 PF: > { %s296_s27 = sand.u32 1, %s558_s9   ;;  %p746_p12 = scmp.ge.s32.totalorder %s570_s12, 2 }
 0x297   : > { %s297_s4 = scalar_lea.sflag [#allocation4], %s296_s27 }
 0x298   : > { %p405_p13 = pnand %p746_p12, %p627_p6 }
 0x29a   : > { %p406_p0 = pneg %p405_p13 }
 0x29c   : > { %553 = dma.done.wait (%p406_p0), %s297_s4, 128  }
 0x29d   : > { %555 = vsyncadd (%p406_p0), %s297_s4, 4294967168  ;;  %p16_p5 = scmp.ge.s32.totalorder %s643_s21, 4   ;;  %s747_s9 = smov %s562_s10 }
 0x29e   : > { %s748_s10 = smov %s566_s11  ;;  %s749_s11 = smov %s653_s25 }
 0x29f   : > { %s750_s12 = smov %s643_s21  ;;  %18 = sbr.rel (!%p16_p5) target bundleno = 6 (0x6), region = 78 }
 0x2a4   :  { %303 = vsyncpa [#allocation3], 1 }
 0x2a5   :  { %305 = vsyncpa [#allocation3 + $0x1], 1 }
 0x2a6   :  { %306 = vsyncpa [#allocation4], 1 }
 0x2a7   :  { %308 = vsyncpa [#allocation4 + $0x1], 1 }
 0x2a8   :  { %309 = vsyncpa [#allocation5], 1 }
 0x2a9   :  { %311 = vsyncpa [#allocation5 + $0x1], 1 }

</bundles_post_ra>
